<compile_context>
chip_gen: v7x
topology: tpu7x:2x2x1
jax: 0.10.0
libtpu: 0.0.40
codegen_flags: <defaults>
</compile_context>

<pallas_src>
import math

import jax
import jax.numpy as jnp
from jax.experimental import pallas as pl
from jax.experimental.pallas import tpu as pltpu

# ---------------- model hyper-parameters (small, consistent with Block) ------
B = 2            # batch
N = 8            # sequence length
DIM = 32         # embedding dim
NUM_HEADS = 4    # heads -> head_dim = 8
MLP_RATIO = 4.0
HIDDEN = int(DIM * MLP_RATIO)      # 128
LN_EPS = 1e-5
HEAD_DIM = DIM // NUM_HEADS
ATTN_SCALE = 1.0 / math.sqrt(HEAD_DIM)   # SDPA default scale (= qk_scale default)

TOKENS = B * N                     # 16  (batch flattened into matmul M dim)
HT = NUM_HEADS * TOKENS            # 64  (heads also folded into M dim for attention)
VEC_W = max(DIM, HIDDEN)           # 128 (lane width of the constant slab)
W_SLAB_COLS = 4 * DIM + HIDDEN     # 256 ([w_qkv | w_proj | w_fc1])

assert DIM % NUM_HEADS == 0

# Constant-slab row offsets (all multiples of 8 -> sublane-tile aligned).
R_LN1_G = 0 * TOKENS
R_LN1_B = 1 * TOKENS
R_BPROJ = 2 * TOKENS
R_LN2_G = 3 * TOKENS
R_LN2_B = 4 * TOKENS
R_BFC2 = 5 * TOKENS
R_BFC1 = 6 * TOKENS
R_ABIAS = 7 * TOKENS               # 112: additive attention bias, (HT, HT)
R_LMASK = R_ABIAS + HT             # 176: head lane mask, (HT, DIM)
CONST_ROWS = R_LMASK + HT          # 240


def _layernorm(v, gamma, beta):
    mu = jnp.mean(v, axis=-1, keepdims=True)
    var = jnp.mean((v - mu) ** 2, axis=-1, keepdims=True)
    return (v - mu) * jax.lax.rsqrt(var + LN_EPS) * gamma + beta


def _gelu_exact(v):
    # torch.nn.GELU default: exact erf formulation
    return 0.5 * v * (1.0 + jax.lax.erf(v * (1.0 / math.sqrt(2.0))))


def block_kernel(
    x_ref,        # (T, C)              flattened activations
    w_ref,        # (C, 3C + C + H)     [w_qkv(scale-folded) | w_proj | w_fc1]
    wfc2_ref,     # (H, C)
    c_ref,        # (CONST_ROWS, VEC_W) pre-broadcast LN/bias rows + attn masks
    o_ref,        # (T, C)
):
    x = x_ref[...]                                        # (T, C)

    # Pre-broadcast parameter rows (no in-kernel sublane broadcasts needed).
    ln1_g = c_ref[R_LN1_G:R_LN1_G + TOKENS, :DIM]
    ln1_b = c_ref[R_LN1_B:R_LN1_B + TOKENS, :DIM]
    b_proj = c_ref[R_BPROJ:R_BPROJ + TOKENS, :DIM]
    ln2_g = c_ref[R_LN2_G:R_LN2_G + TOKENS, :DIM]
    ln2_b = c_ref[R_LN2_B:R_LN2_B + TOKENS, :DIM]
    b_fc2 = c_ref[R_BFC2:R_BFC2 + TOKENS, :DIM]
    b_fc1 = c_ref[R_BFC1:R_BFC1 + TOKENS, :HIDDEN]
    attn_bias = c_ref[R_ABIAS:R_ABIAS + HT, :HT]          # (HT, HT)  0 / -1e30
    lane_mask = c_ref[R_LMASK:R_LMASK + HT, :DIM]         # (HT, C)   0 / 1

    w_qkv = w_ref[:, 0:3 * DIM]                           # (C, 3C)  Q cols pre-scaled
    w_proj = w_ref[:, 3 * DIM:4 * DIM]                    # (C, C)
    w_fc1 = w_ref[:, 4 * DIM:4 * DIM + HIDDEN]            # (C, H)

    # ---- norm1 + fused multi-head attention ----
    xn = _layernorm(x, ln1_g, ln1_b)
    qkv = jnp.dot(xn, w_qkv, preferred_element_type=jnp.float32)   # (T, 3C)

    # Fold heads into the M/sublane dim: replicate the token rows H times.
    # Row h*T + t of the replicated tensor is "token t, as seen by head h".
    qkv_rep = jnp.concatenate([qkv] * NUM_HEADS, axis=0)           # (HT, 3C)
    q = qkv_rep[:, 0:DIM]                                          # (HT, C)
    k = qkv_rep[:, DIM:2 * DIM] * lane_mask      # keep only own-head lanes
    v = qkv_rep[:, 2 * DIM:3 * DIM] * lane_mask  # keep only own-head lanes

    # One score matmul for all heads: masking K restricts the contraction of
    # the diagonal (same-head) blocks to that head's 8 lanes; cross-head /
    # cross-batch blocks are killed by the additive bias below.
    s = jax.lax.dot_general(q, k, (((1,), (1,)), ((), ())),
                            preferred_element_type=jnp.float32)    # (HT, HT)
    s = s + attn_bias
    s = s - jnp.max(s, axis=-1, keepdims=True)
    p = jnp.exp(s)                                # masked entries underflow to exactly 0
    o_h = jnp.dot(p, v, preferred_element_type=jnp.float32)        # (HT, C)
    # Flash-style: normalize the (HT, C) output instead of the (HT, HT) probs.
    o_h = o_h * pl.reciprocal(jnp.sum(p, axis=-1, keepdims=True), approx=True)

    # Un-interleave heads: head h's output occupies only its own lane group
    # (zeros elsewhere, thanks to the V lane mask), so summing the row blocks
    # re-assembles (T, C) with pure vector adds — no lane/sublane relayout.
    attn_out = o_h[0:TOKENS]
    for h in range(1, NUM_HEADS):
        attn_out = attn_out + o_h[h * TOKENS:(h + 1) * TOKENS]     # (T, C)

    y = jnp.dot(attn_out, w_proj, preferred_element_type=jnp.float32) + b_proj
    x1 = x + y                                            # residual 1

    # ---- norm2 + MLP ----
    xn2 = _layernorm(x1, ln2_g, ln2_b)
    h1 = _gelu_exact(jnp.dot(xn2, w_fc1, preferred_element_type=jnp.float32) + b_fc1)
    h2 = jnp.dot(h1, wfc2_ref[...], preferred_element_type=jnp.float32) + b_fc2

    o_ref[...] = x1 + h2                                  # residual 2


def pack_params(p):
    """Build the 3 device slabs ONCE (outside the per-call jit path).

    Returns (w_slab, w_fc2, const_slab).
    """
    # Fold the SDPA scale into the Q columns of the QKV weight.
    w_q = p["w_qkv"][:, :DIM] * ATTN_SCALE
    w_slab = jnp.concatenate([w_q, p["w_qkv"][:, DIM:], p["w_proj"], p["w_fc1"]],
                             axis=1)                                 # (C, 256)

    def bc(v):  # (1, w) -> (TOKENS, VEC_W), pre-broadcast + lane-pad
        v = jnp.broadcast_to(v, (TOKENS, v.shape[-1]))
        return jnp.pad(v, ((0, 0), (0, VEC_W - v.shape[-1])))

    # Combined head+batch block-diagonal additive mask over the fused (HT) dim.
    r = jnp.arange(HT)
    grp = (r // TOKENS) * B + (r % TOKENS) // N           # (head, batch) group id
    attn_bias = jnp.where(grp[:, None] == grp[None, :], 0.0, -1e30)
    attn_bias = attn_bias.astype(jnp.float32)                        # (HT, HT)

    # Per-row head lane mask: row h*T+t keeps only head h's 8-lane group.
    lane_head = jnp.arange(DIM) // HEAD_DIM
    lane_mask = ((r // TOKENS)[:, None] == lane_head[None, :]).astype(jnp.float32)

    const_slab = jnp.concatenate(
        [bc(p["ln1_g"]), bc(p["ln1_b"]), bc(p["b_proj"]),
         bc(p["ln2_g"]), bc(p["ln2_b"]), bc(p["b_fc2"]), bc(p["b_fc1"]),
         jnp.pad(attn_bias, ((0, 0), (0, VEC_W - HT))),
         jnp.pad(lane_mask, ((0, 0), (0, VEC_W - DIM)))],
        axis=0)                                                      # (240, 128)
    assert const_slab.shape == (CONST_ROWS, VEC_W)
    return w_slab, p["w_fc2"], const_slab


@jax.jit
def vjepa_block(x, w_slab, w_fc2, const_slab):
    """x: (B, N, C) float32; slabs: output of pack_params (built once)."""
    x2d = x.reshape(TOKENS, DIM)                          # free reshape outside the kernel

    vmem = lambda: pl.BlockSpec(memory_space=pltpu.MemorySpace.VMEM)
    out2d = pl.pallas_call(
        block_kernel,
        out_shape=jax.ShapeDtypeStruct((TOKENS, DIM), jnp.float32),
        in_specs=[vmem(), vmem(), vmem(), vmem()],        # whole arrays resident in VMEM
        out_specs=vmem(),
    )(x2d, w_slab, w_fc2, const_slab)
    return out2d.reshape(B, N, DIM)


def reference_block(x, p):
    """Pure-JAX reference with identical semantics (for validation)."""
    def ln(v, g, b):
        mu = jnp.mean(v, -1, keepdims=True)
        var = jnp.mean((v - mu) ** 2, -1, keepdims=True)
        return (v - mu) / jnp.sqrt(var + LN_EPS) * g + b

    xn = ln(x, p["ln1_g"], p["ln1_b"])
    qkv = xn @ p["w_qkv"]                                   # (B, N, 3C)
    q, k, v = jnp.split(qkv, 3, axis=-1)

    def heads(t):  # (B, N, C) -> (B, H, N, hd)
        return t.reshape(B, N, NUM_HEADS, HEAD_DIM).transpose(0, 2, 1, 3)

    q, k, v = heads(q), heads(k), heads(v)
    s = jnp.einsum("bhqd,bhkd->bhqk", q, k) * ATTN_SCALE
    a = jax.nn.softmax(s, axis=-1)
    o = jnp.einsum("bhqk,bhkd->bhqd", a, v)
    o = o.transpose(0, 2, 1, 3).reshape(B, N, DIM)
    y = o @ p["w_proj"] + p["b_proj"]
    x1 = x + y
    xn2 = ln(x1, p["ln2_g"], p["ln2_b"])
    h1 = jax.nn.gelu(xn2 @ p["w_fc1"] + p["b_fc1"], approximate=False)
    return x1 + (h1 @ p["w_fc2"] + p["b_fc2"])


def make_params(key):
    ks = jax.random.split(key, 8)
    s = 0.05
    return {
        "ln1_g": jnp.ones((1, DIM), jnp.float32),
        "ln1_b": jnp.zeros((1, DIM), jnp.float32),
        "w_qkv": s * jax.random.normal(ks[0], (DIM, 3 * DIM), jnp.float32),
        "w_proj": s * jax.random.normal(ks[1], (DIM, DIM), jnp.float32),
        "b_proj": s * jax.random.normal(ks[2], (1, DIM), jnp.float32),
        "ln2_g": jnp.ones((1, DIM), jnp.float32),
        "ln2_b": jnp.zeros((1, DIM), jnp.float32),
        "w_fc1": s * jax.random.normal(ks[3], (DIM, HIDDEN), jnp.float32),
        "b_fc1": s * jax.random.normal(ks[4], (1, HIDDEN), jnp.float32),
        "w_fc2": s * jax.random.normal(ks[5], (HIDDEN, DIM), jnp.float32),
        "b_fc2": s * jax.random.normal(ks[6], (1, DIM), jnp.float32),
    }


if __name__ == "__main__":
    key = jax.random.PRNGKey(0)
    kx, kp = jax.random.split(key)
    x = jax.random.normal(kx, (B, N, DIM), jnp.float32)
    params = make_params(kp)

    # One-time parameter packing (hoisted out of the per-call path).
    slabs = jax.block_until_ready(pack_params(params))

    out = jax.block_until_ready(vjepa_block(x, *slabs))
    ref = jax.block_until_ready(reference_block(x, params))

    assert out.shape == (B, N, DIM)
    max_err = float(jnp.max(jnp.abs(out - ref)))
    # Slightly relaxed tolerance vs the exact path to allow the EUP
    # approximate-reciprocal softmax denominator (pl.reciprocal(approx=True)).
    assert jnp.allclose(out, ref, atol=2e-4, rtol=2e-4), max_err

    print("KERNEL_OK")
</pallas_src>

<mosaic_0001>
module attributes {stable_mosaic.version = 11 : i64} {
  func.func @block_kernel(%arg0: memref<16x32xf32, #tpu.memory_space<vmem>>, %arg1: memref<32x256xf32, #tpu.memory_space<vmem>>, %arg2: memref<128x32xf32, #tpu.memory_space<vmem>>, %arg3: memref<240x128xf32, #tpu.memory_space<vmem>>, %arg4: memref<16x32xf32, #tpu.memory_space<vmem>>) attributes {dimension_semantics = [], scalar_prefetch = 0 : i64, scratch_operands = 0 : i64, tpu.core_type = #tpu.core_type<tc>} {
    %c0 = arith.constant 0 : index
    %c0_0 = arith.constant 0 : index
    %0 = vector.load %arg0[%c0, %c0_0] : memref<16x32xf32, #tpu.memory_space<vmem>>, vector<16x32xf32>
    %c0_1 = arith.constant 0 : index
    %c0_2 = arith.constant 0 : index
    %1 = vector.load %arg3[%c0_1, %c0_2] : memref<240x128xf32, #tpu.memory_space<vmem>>, vector<16x32xf32>
    %c16 = arith.constant 16 : index
    %c0_3 = arith.constant 0 : index
    %2 = vector.load %arg3[%c16, %c0_3] : memref<240x128xf32, #tpu.memory_space<vmem>>, vector<16x32xf32>
    %c32 = arith.constant 32 : index
    %c0_4 = arith.constant 0 : index
    %3 = vector.load %arg3[%c32, %c0_4] : memref<240x128xf32, #tpu.memory_space<vmem>>, vector<16x32xf32>
    %c48 = arith.constant 48 : index
    %c0_5 = arith.constant 0 : index
    %4 = vector.load %arg3[%c48, %c0_5] : memref<240x128xf32, #tpu.memory_space<vmem>>, vector<16x32xf32>
    %c64 = arith.constant 64 : index
    %c0_6 = arith.constant 0 : index
    %5 = vector.load %arg3[%c64, %c0_6] : memref<240x128xf32, #tpu.memory_space<vmem>>, vector<16x32xf32>
    %c80 = arith.constant 80 : index
    %c0_7 = arith.constant 0 : index
    %6 = vector.load %arg3[%c80, %c0_7] : memref<240x128xf32, #tpu.memory_space<vmem>>, vector<16x32xf32>
    %c96 = arith.constant 96 : index
    %c0_8 = arith.constant 0 : index
    %7 = vector.load %arg3[%c96, %c0_8] : memref<240x128xf32, #tpu.memory_space<vmem>>, vector<16x128xf32>
    %c112 = arith.constant 112 : index
    %c0_9 = arith.constant 0 : index
    %8 = vector.load %arg3[%c112, %c0_9] : memref<240x128xf32, #tpu.memory_space<vmem>>, vector<64x64xf32>
    %c176 = arith.constant 176 : index
    %c0_10 = arith.constant 0 : index
    %9 = vector.load %arg3[%c176, %c0_10] : memref<240x128xf32, #tpu.memory_space<vmem>>, vector<64x32xf32>
    %c0_11 = arith.constant 0 : index
    %c0_12 = arith.constant 0 : index
    %10 = vector.load %arg1[%c0_11, %c0_12] : memref<32x256xf32, #tpu.memory_space<vmem>>, vector<32x96xf32>
    %c0_13 = arith.constant 0 : index
    %c96_14 = arith.constant 96 : index
    %11 = vector.load %arg1[%c0_13, %c96_14] : memref<32x256xf32, #tpu.memory_space<vmem>>, vector<32x32xf32>
    %c0_15 = arith.constant 0 : index
    %c128 = arith.constant 128 : index
    %12 = vector.load %arg1[%c0_15, %c128] : memref<32x256xf32, #tpu.memory_space<vmem>>, vector<32x128xf32>
    %cst = arith.constant dense<0.000000e+00> : vector<16xf32>
    %13 = vector.multi_reduction <add>, %0, %cst [1] : vector<16x32xf32> to vector<16xf32>
    %14 = vector.shape_cast %13 : vector<16xf32> to vector<16x1xf32>
    %cst_16 = arith.constant 3.200000e+01 : f32
    %15 = vector.broadcast %cst_16 : f32 to vector<16x1xf32>
    %16 = arith.divf %14, %15 : vector<16x1xf32>
    %17 = vector.broadcast %16 : vector<16x1xf32> to vector<16x32xf32>
    %18 = arith.subf %0, %17 : vector<16x32xf32>
    %19 = arith.mulf %18, %18 : vector<16x32xf32>
    %cst_17 = arith.constant dense<0.000000e+00> : vector<16xf32>
    %20 = vector.multi_reduction <add>, %19, %cst_17 [1] : vector<16x32xf32> to vector<16xf32>
    %21 = vector.shape_cast %20 : vector<16xf32> to vector<16x1xf32>
    %cst_18 = arith.constant 3.200000e+01 : f32
    %22 = vector.broadcast %cst_18 : f32 to vector<16x1xf32>
    %23 = arith.divf %21, %22 : vector<16x1xf32>
    %24 = vector.broadcast %16 : vector<16x1xf32> to vector<16x32xf32>
    %25 = arith.subf %0, %24 : vector<16x32xf32>
    %cst_19 = arith.constant 9.99999974E-6 : f32
    %26 = vector.broadcast %cst_19 : f32 to vector<16x1xf32>
    %27 = arith.addf %23, %26 : vector<16x1xf32>
    %28 = math.rsqrt %27 : vector<16x1xf32>
    %29 = vector.broadcast %28 : vector<16x1xf32> to vector<16x32xf32>
    %30 = arith.mulf %25, %29 : vector<16x32xf32>
    %31 = arith.mulf %30, %1 : vector<16x32xf32>
    %32 = arith.addf %31, %2 : vector<16x32xf32>
    %cst_20 = arith.constant dense<0.000000e+00> : vector<16x96xf32>
    %33 = tpu.matmul %32, %10, %cst_20 {dimension_numbers = #tpu.dot_dimension_numbers<[1], [0], [0], [1], [0, 0, 1, 1], [], []>} : vector<16x32xf32>, vector<32x96xf32>, vector<16x96xf32> -> vector<16x96xf32>
    %34 = tpu.concatenate %33, %33, %33, %33 in 0 : vector<16x96xf32>, vector<16x96xf32>, vector<16x96xf32>, vector<16x96xf32> -> vector<64x96xf32>
    %35 = vector.extract_strided_slice %34 {offsets = [0, 0], sizes = [64, 32], strides = [1, 1]} : vector<64x96xf32> to vector<64x32xf32>
    %36 = vector.extract_strided_slice %34 {offsets = [0, 32], sizes = [64, 32], strides = [1, 1]} : vector<64x96xf32> to vector<64x32xf32>
    %37 = arith.mulf %36, %9 : vector<64x32xf32>
    %38 = vector.extract_strided_slice %34 {offsets = [0, 64], sizes = [64, 32], strides = [1, 1]} : vector<64x96xf32> to vector<64x32xf32>
    %39 = arith.mulf %38, %9 : vector<64x32xf32>
    %cst_21 = arith.constant dense<0.000000e+00> : vector<64x64xf32>
    %40 = tpu.matmul %35, %37, %cst_21 {dimension_numbers = #tpu.dot_dimension_numbers<[1], [1], [0], [0], [0, 0, 1, 0], [], []>} : vector<64x32xf32>, vector<64x32xf32>, vector<64x64xf32> -> vector<64x64xf32>
    %41 = arith.addf %40, %8 : vector<64x64xf32>
    %cst_22 = arith.constant dense<0xFF800000> : vector<64xf32>
    %42 = vector.multi_reduction <maximumf>, %41, %cst_22 [1] : vector<64x64xf32> to vector<64xf32>
    %43 = vector.shape_cast %42 : vector<64xf32> to vector<64x1xf32>
    %44 = vector.broadcast %43 : vector<64x1xf32> to vector<64x64xf32>
    %45 = arith.subf %41, %44 : vector<64x64xf32>
    %46 = math.exp %45 : vector<64x64xf32>
    %cst_23 = arith.constant dense<0.000000e+00> : vector<64x32xf32>
    %47 = tpu.matmul %46, %39, %cst_23 {dimension_numbers = #tpu.dot_dimension_numbers<[1], [0], [0], [1], [0, 0, 1, 1], [], []>} : vector<64x64xf32>, vector<64x32xf32>, vector<64x32xf32> -> vector<64x32xf32>
    %cst_24 = arith.constant dense<0.000000e+00> : vector<64xf32>
    %48 = vector.multi_reduction <add>, %46, %cst_24 [1] : vector<64x64xf32> to vector<64xf32>
    %49 = vector.shape_cast %48 : vector<64xf32> to vector<64x1xf32>
    %50 = tpu.reciprocal %49 {approx = true} : vector<64x1xf32> -> vector<64x1xf32>
    %51 = vector.broadcast %50 : vector<64x1xf32> to vector<64x32xf32>
    %52 = arith.mulf %47, %51 : vector<64x32xf32>
    %53 = vector.extract_strided_slice %52 {offsets = [0, 0], sizes = [16, 32], strides = [1, 1]} : vector<64x32xf32> to vector<16x32xf32>
    %54 = vector.extract_strided_slice %52 {offsets = [16, 0], sizes = [16, 32], strides = [1, 1]} : vector<64x32xf32> to vector<16x32xf32>
    %55 = arith.addf %53, %54 : vector<16x32xf32>
    %56 = vector.extract_strided_slice %52 {offsets = [32, 0], sizes = [16, 32], strides = [1, 1]} : vector<64x32xf32> to vector<16x32xf32>
    %57 = arith.addf %55, %56 : vector<16x32xf32>
    %58 = vector.extract_strided_slice %52 {offsets = [48, 0], sizes = [16, 32], strides = [1, 1]} : vector<64x32xf32> to vector<16x32xf32>
    %59 = arith.addf %57, %58 : vector<16x32xf32>
    %cst_25 = arith.constant dense<0.000000e+00> : vector<16x32xf32>
    %60 = tpu.matmul %59, %11, %cst_25 {dimension_numbers = #tpu.dot_dimension_numbers<[1], [0], [0], [1], [0, 0, 1, 1], [], []>} : vector<16x32xf32>, vector<32x32xf32>, vector<16x32xf32> -> vector<16x32xf32>
    %61 = arith.addf %60, %3 : vector<16x32xf32>
    %62 = arith.addf %0, %61 : vector<16x32xf32>
    %cst_26 = arith.constant dense<0.000000e+00> : vector<16xf32>
    %63 = vector.multi_reduction <add>, %62, %cst_26 [1] : vector<16x32xf32> to vector<16xf32>
    %64 = vector.shape_cast %63 : vector<16xf32> to vector<16x1xf32>
    %cst_27 = arith.constant 3.200000e+01 : f32
    %65 = vector.broadcast %cst_27 : f32 to vector<16x1xf32>
    %66 = arith.divf %64, %65 : vector<16x1xf32>
    %67 = vector.broadcast %66 : vector<16x1xf32> to vector<16x32xf32>
    %68 = arith.subf %62, %67 : vector<16x32xf32>
    %69 = arith.mulf %68, %68 : vector<16x32xf32>
    %cst_28 = arith.constant dense<0.000000e+00> : vector<16xf32>
    %70 = vector.multi_reduction <add>, %69, %cst_28 [1] : vector<16x32xf32> to vector<16xf32>
    %71 = vector.shape_cast %70 : vector<16xf32> to vector<16x1xf32>
    %cst_29 = arith.constant 3.200000e+01 : f32
    %72 = vector.broadcast %cst_29 : f32 to vector<16x1xf32>
    %73 = arith.divf %71, %72 : vector<16x1xf32>
    %74 = vector.broadcast %66 : vector<16x1xf32> to vector<16x32xf32>
    %75 = arith.subf %62, %74 : vector<16x32xf32>
    %cst_30 = arith.constant 9.99999974E-6 : f32
    %76 = vector.broadcast %cst_30 : f32 to vector<16x1xf32>
    %77 = arith.addf %73, %76 : vector<16x1xf32>
    %78 = math.rsqrt %77 : vector<16x1xf32>
    %79 = vector.broadcast %78 : vector<16x1xf32> to vector<16x32xf32>
    %80 = arith.mulf %75, %79 : vector<16x32xf32>
    %81 = arith.mulf %80, %4 : vector<16x32xf32>
    %82 = arith.addf %81, %5 : vector<16x32xf32>
    %cst_31 = arith.constant dense<0.000000e+00> : vector<16x128xf32>
    %83 = tpu.matmul %82, %12, %cst_31 {dimension_numbers = #tpu.dot_dimension_numbers<[1], [0], [0], [1], [0, 0, 1, 1], [], []>} : vector<16x32xf32>, vector<32x128xf32>, vector<16x128xf32> -> vector<16x128xf32>
    %84 = arith.addf %83, %7 : vector<16x128xf32>
    %cst_32 = arith.constant 5.000000e-01 : f32
    %85 = vector.broadcast %cst_32 : f32 to vector<16x128xf32>
    %86 = arith.mulf %85, %84 : vector<16x128xf32>
    %cst_33 = arith.constant 0.707106769 : f32
    %87 = vector.broadcast %cst_33 : f32 to vector<16x128xf32>
    %88 = arith.mulf %84, %87 : vector<16x128xf32>
    %89 = math.erf %88 : vector<16x128xf32>
    %cst_34 = arith.constant 1.000000e+00 : f32
    %90 = vector.broadcast %cst_34 : f32 to vector<16x128xf32>
    %91 = arith.addf %90, %89 : vector<16x128xf32>
    %92 = arith.mulf %86, %91 : vector<16x128xf32>
    %c0_35 = arith.constant 0 : index
    %c0_36 = arith.constant 0 : index
    %93 = vector.load %arg2[%c0_35, %c0_36] : memref<128x32xf32, #tpu.memory_space<vmem>>, vector<128x32xf32>
    %cst_37 = arith.constant dense<0.000000e+00> : vector<16x32xf32>
    %94 = tpu.matmul %92, %93, %cst_37 {dimension_numbers = #tpu.dot_dimension_numbers<[1], [0], [0], [1], [0, 0, 1, 1], [], []>} : vector<16x128xf32>, vector<128x32xf32>, vector<16x32xf32> -> vector<16x32xf32>
    %95 = arith.addf %94, %6 : vector<16x32xf32>
    %96 = arith.addf %62, %95 : vector<16x32xf32>
    %c0_38 = arith.constant 0 : index
    %c0_39 = arith.constant 0 : index
    %97 = vector.load %arg4[%c0_38, %c0_39] : memref<16x32xf32, #tpu.memory_space<vmem>>, vector<16x32xf32>
    tpu.vector_store %arg4[%c0_38, %c0_39], %96 {strides = array<i32>} : memref<16x32xf32, #tpu.memory_space<vmem>>, vector<16x32xf32>,
    return
  }
}

</mosaic_0001>

<bundles_post_ra>
// kernel: vjepa_block.1
= control target key start
LH: loop header
LB: loop body
LE: loop exit
PB: predicated region body
PF: predicated region fallthrough
CT: control target
= control target key end

     0   :  { %9 = vsyncpa [#allocation3], 0  ;;  %s1800_s0 = inlined_call_operand.vmem [shape: f32[16,32], index: 0, kind: input, shape index: {}]   ;;  %s1801_s1 = inlined_call_operand.vmem [shape: f32[32,256], index: 1, kind: input, shape index: {}]   ;;  %s1802_s2 = inlined_call_operand.vmem [shape: f32[128,32], index: 2, kind: input, shape index: {}]   ;;  %s1803_s3 = inlined_call_operand.hbm [shape: f32[240,128], index: 3, kind: input, shape index: {}]   ;;  %s1804_s4 = inlined_call_operand.hbm [shape: f32[16,32], index: 4, kind: output, shape index: {}]  }
   0x1   :  { %10 = vsyncpa [#allocation4], 0  ;;  %s1463_s15 = smov [#allocation2]   ;;  %s1415_s19 = scalar_lea.hbm %s1803_s3, 3840 }
   0x2   :  { %s22_s16 = sshll.u32 %s1463_s15, 4  ;;  %p1416_p0 = scmp.ne.s32.totalorder %s1803_s3, %s1415_s19  ;;  %s23_s16 = int_to_ptr.vmem [resolvable:$true] %s22_s16 }
   0x3   :  { %p1419_p1 = scmp.lt.u32.totalorder %s1415_s19, %s1803_s3 }
   0x5   :  { %p1421_p2 = pnand %p1419_p1, %p1416_p0 }
   0x7   :  { %1424 = shalt.err (!%p1421_p2)
}
   0x8   :  { %s1425_s24 = scalar_lea.vmem %s23_s16, 3840  ;;  %p1430_p4 = scmp.lt.s32.totalorder %s23_s16, %s23_s16 }
   0x9   :  { %p1426_p3 = scmp.ne.s32.totalorder %s23_s16, %s1425_s24  ;;  %p1431_p5 = scmp.lt.s32.totalorder %s1425_s24, %s1425_s24 }
   0xb   :  { %p1432_p6 = por %p1431_p5, %p1430_p4 }
   0xd   :  { %p1433_p7 = pnand %p1432_p6, %p1426_p3 }
   0xf   :  { %1436 = shalt.err (!%p1433_p7)
}
  0x10   :  { %s1464_s25 = smov 128   ;;  %s1465_s26 = smov 8  }
  0x11   :  { %28 = dma.hbm_to_vmem [thread:$0]  %s1803_s3, 3840, %s23_s16, [#allocation3], %s1464_s25, %s1464_s25, %s1465_s26  }
  0x12   :  { %1459 = dma.done.wait [#allocation3], 3840  }
  0x13   :  { %1460 = vsyncadd [#allocation3], 4294963456  ;;  %vm72_vm0 = vcmask 261120   ;;  %v1513_v0 = vld [vmem:[%s1800_s0] sm:$0xff]  ;;  %v1518_v1 = vld [vmem:[%s1800_s0 + $0x8] sm:$0xff]  ;;  %s1466_s13 = smov 32  }
  0x14   :  { %v73_v2 = vsel %vm72_vm0, %v1513_v0, 0.0  ;;  %v76_v3 = vsel %vm72_vm0, %v1518_v1, 0.0  ;;  %v1531_v14 = vld [vmem:[%s1801_s1] sm:$0xff]  ;;  %v1536_v15 = vld [vmem:[%s1801_s1 + $0x10] sm:$0xff]  ;;  %v1554_v21 = vld [vmem:[#allocation2 + $0xb8] sm:$0xff]  ;;  %s1467_s14 = smov 96  }
  0x15   :  { %74 = vadd.xlane.f32.xlu0 %v73_v2  ;;  %v1541_v16 = vld [vmem:[%s1801_s1 + $0x20] sm:$0xff]  ;;  %v1361_v17 = vpack.i.bf16 %v1536_v15, %v1531_v14  ;;  %v1218_v18 = vpack.c.bf16 %v1536_v15, %v1531_v14  ;;  %v1550_v19 = vld [vmem:[%s1801_s1 + $0x30] sm:$0xff]  ;;  %v59_v25 = vld [vmem:[#allocation2 + $0xc8] sm:$0xff]  ;;  %s1468_s15 = smov 64   ;;  %vm408_vm2 = vcmask 523264  }
  0x16   :  { %v1222_v20 = vpack.c.bf16 %v1550_v19, %v1541_v16  ;;  %v1558_v22 = vld [vmem:[#allocation2 + $0xb0] sm:$0xff]  ;;  %v1560_v23 = vld [vmem:[#allocation2 + $0xc0] sm:$0xff]  ;;  %v61_v27 = vld [vmem:[#allocation2 + $0xd8] sm:$0xff] }
  0x17   :  { %1219 = vmatprep.subr.bf16.mxu0 %v1218_v18  ;;  %v1564_v24 = vld [vmem:[#allocation2 + $0xd0] sm:$0xff]  ;;  %v1570_v26 = vld [vmem:[#allocation2 + $0xe0] sm:$0xff]  ;;  %v63_v28 = vld [vmem:[#allocation2 + $0xe8] sm:$0xff] }
  0x18   :  { %1221 = vmatpush3.bf16.msra.mxu0 %v1218_v18  ;;  %v34_v36 = vld [vmem:[#allocation2] sm:$0xff]  ;;  %v36_v38 = vld [vmem:[#allocation2 + $0x10] sm:$0xff]  ;;  %v35_v41 = vld [vmem:[#allocation2 + $0x8] sm:$0xff] }
  0x19   :  { %77 = vadd.xlane.f32.xlu0 %v76_v3  ;;  %1223 = vmatprep.subr.bf16.mxu0 %v1222_v20  ;;  %v37_v44 = vld [vmem:[#allocation2 + $0x18] sm:$0xff]  ;;  %vm1608_vm1 = vmpackc.low %vm72_vm0, %vm72_vm0 }
  0x1c   :  { %1225 = vmatpush3.bf16.msra.mxu0 %v1222_v20 }
  0x2f   :  { %193 = vrot.lane.b32.xlu0 %v1558_v22, %s1466_s13 }
  0x33   :  { %201 = vrot.lane.b32.xlu0 %v1564_v24, %s1466_s13 }
  0x37   :  { %205 = vrot.lane.b32.xlu0 %v1570_v26, %s1466_s13 }
  0xa2   :  { %v75_v4 = vpop.xlane.xlu0 %74 }
  0xa3   :  { %v80_v5 = vmul.f32 0.03125, %v75_v4 }
  0xa5   :  { %v82_v6 = vsub.f32 %v1513_v0, %v80_v5 }
  0xa6   :  { %v78_v7 = vpop.xlane.xlu0 %77 }
  0xa7   :  { %v81_v8 = vmul.f32 0.03125, %v78_v7  ;;  %v84_v9 = vmul.f32 %v82_v6, %v82_v6 }
  0xa9   :  { %v83_v10 = vsub.f32 %v1518_v1, %v81_v8  ;;  %v86_v11 = vsel %vm72_vm0, %v84_v9, 0.0 }
  0xaa   :  { %87 = vadd.xlane.f32.xlu1 %v86_v11  ;;  %v194_v50 = vpop.permute.xlu0 %193 }
  0xab   :  { %v85_v12 = vmul.f32 %v83_v10, %v83_v10 }
  0xad   :  { %v89_v13 = vsel %vm72_vm0, %v85_v12, 0.0 }
  0xae   :  { %90 = vadd.xlane.f32.xlu1 %v89_v13  ;;  %v202_v52 = vpop.permute.xlu0 %201 }
  0xb2   :  { %v206_v54 = vpop.permute.xlu0 %205 }
  0xbf   :  { %195 = vrot.lane.b32.xlu1 %v1554_v21, %s1466_s13 }
  0xc3   :  { %197 = vrot.lane.b32.xlu1 %v1560_v23, %s1466_s13 }
  0xc7   :  { %199 = vrot.lane.b32.xlu1 %v59_v25, %s1466_s13 }
  0xcb   :  { %203 = vrot.lane.b32.xlu1 %v61_v27, %s1466_s13 }
  0xcf   :  { %207 = vrot.lane.b32.xlu1 %v63_v28, %s1466_s13 }
 0x137   :  { %v88_v29 = vpop.xlane.xlu1 %87 }
 0x138   :  { %v92_v30 = vmul.f32 0.03125, %v88_v29 }
 0x13a   :  { %v94_v31 = vadd.f32 1e-05, %v92_v30 }
 0x13b   :  { %v91_v32 = vpop.xlane.xlu1 %90 }
 0x13c   :  { %1371 = vrsqrt.f32 %v94_v31  ;;  %v93_v33 = vmul.f32 0.03125, %v91_v32 }
 0x13e   :  { %v95_v34 = vadd.f32 1e-05, %v93_v33 }
 0x13f   :  { %v196_v47 = vpop.permute.xlu1 %195 }
 0x140   :  { %1373 = vrsqrt.f32 %v95_v34 }
 0x143   :  { %v198_v48 = vpop.permute.xlu1 %197 }
 0x146   :  { %v1372_v35 = vpop.eup %1371 }
 0x147   :  { %v98_v37 = vmul.f32 %v1372_v35, %v82_v6  ;;  %v200_v49 = vpop.permute.xlu1 %199 }
 0x149   :  { %v100_v39 = vmul.f32 %v98_v37, %v34_v36 }
 0x14a   :  { %v1374_v40 = vpop.eup %1373 }
 0x14b   :  { %v102_v42 = vadd.f32 %v100_v39, %v36_v38  ;;  %v99_v43 = vmul.f32 %v1374_v40, %v83_v10  ;;  %v204_v51 = vpop.permute.xlu1 %203 }
 0x14d   :  { %1102 = vmatprep.mubr.msk.f32.mxu0 %vm72_vm0, %v102_v42  ;;  %v101_v45 = vmul.f32 %v99_v43, %v35_v41 }
 0x14f   :  { %v103_v46 = vadd.f32 %v101_v45, %v37_v44  ;;  %v208_v53 = vpop.permute.xlu1 %207 }
 0x151   :  { %1103 = vmatmul.mubr.msk.f32.vlgmr.msra.gmra.mrb[0].mxu0 %vm72_vm0, %v103_v46 }
 0x224   :  { %v1579_v55 = vpop.f32.mrb[0].mxu0 }
 0x225   :  { %v224_v56 = vmul.f32 %v1579_v55, %v208_v53  ;;  %v1582_v57 = vpop.f32.mrb[1].mxu0  ;;  %v220_v58 = vmul.f32 %v1579_v55, %v200_v49  ;;  %v218_v59 = vmul.f32 %v1579_v55, %v196_v47  ;;  %v222_v60 = vmul.f32 %v1579_v55, %v204_v51  ;;  %v49_v53 = vld [vmem:[#allocation2 + $0x78] sm:$0xff] }
 0x226   :  { %v223_v61 = vmul.f32 %v206_v54, %v1582_v57  ;;  %1121 = vmatprep.mubr.msk.f32.mxu1 %vm72_vm0, %v1582_v57  ;;  %v219_v62 = vmul.f32 %v198_v48, %v1582_v57  ;;  %v217_v63 = vmul.f32 %v194_v50, %v1582_v57  ;;  %v221_v2 = vmul.f32 %v202_v52, %v1582_v57  ;;  %v48_v54 = vld [vmem:[#allocation2 + $0x70] sm:$0xff] }
 0x228   :  { %v1336_v3 = vpack.i.bf16 %v224_v56, %v223_v61  ;;  %v1326_v4 = vpack.i.bf16 %v220_v58, %v219_v62  ;;  %v1321_v5 = vpack.i.bf16 %v218_v59, %v217_v63  ;;  %v1331_v6 = vpack.i.bf16 %v222_v60, %v221_v2  ;;  %v51_v61 = vld [vmem:[#allocation2 + $0x88] sm:$0xff] }
 0x22a   :  { %1327 = vrot.lane.b32.xlu1 %v1326_v4, %s1467_s14  ;;  %1322 = vrot.lane.b32.xlu0 %v1321_v5, %s1467_s14  ;;  %v53_v4 = vld [vmem:[#allocation2 + $0x98] sm:$0xff] }
 0x22e   :  { %1332 = vrot.lane.b32.xlu0 %v1331_v6, %s1467_s14  ;;  %1337 = vrot.lane.b32.xlu1 %v1336_v3, %s1467_s14  ;;  %v50_v3 = vld [vmem:[#allocation2 + $0x80] sm:$0xff] }
 0x232   :  { %225 = vrot.lane.b32.xlu0 %v1558_v22, %s1468_s15  ;;  %227 = vrot.lane.b32.xlu1 %v1554_v21, %s1468_s15 }
 0x236   :  { %229 = vrot.lane.b32.xlu0 %v1560_v23, %s1468_s15  ;;  %231 = vrot.lane.b32.xlu1 %v59_v25, %s1468_s15 }
 0x23a   :  { %233 = vrot.lane.b32.xlu0 %v1564_v24, %s1468_s15  ;;  %235 = vrot.lane.b32.xlu1 %v61_v27, %s1468_s15 }
 0x23e   :  { %237 = vrot.lane.b32.xlu0 %v1570_v26, %s1468_s15  ;;  %239 = vrot.lane.b32.xlu1 %v63_v28, %s1468_s15 }
 0x29c   :  { %v1328_v7 = vpop.permute.xlu1 %1327  ;;  %v1323_v8 = vpop.permute.xlu0 %1322 }
 0x29d   :  { %v1330_v9 = vunpack.i.h.bf16 %v1328_v7  ;;  %v1329_v10 = vunpack.i.l.bf16 %v1328_v7  ;;  %v1325_v11 = vunpack.i.h.bf16 %v1323_v8  ;;  %v1324_v12 = vunpack.i.l.bf16 %v1323_v8 }
 0x29f   :  { %v1226_v18 = vpack.c.bf16 %v1325_v11, %v1324_v12  ;;  %v1232_v22 = vpack.c.bf16 %v1330_v9, %v1329_v10  ;;  %v52_v10 = vld [vmem:[#allocation2 + $0x90] sm:$0xff] }
 0x2a0   :  { %v1338_v20 = vpop.permute.xlu1 %1337  ;;  %v1333_v21 = vpop.permute.xlu0 %1332 }
 0x2a1   :  { %1228 = vmatprep.subr.msk.bf16.mxu1 %vm1608_vm1, %v1226_v18  ;;  %v1335_v25 = vunpack.i.h.bf16 %v1333_v21  ;;  %v1334_v26 = vunpack.i.l.bf16 %v1333_v21  ;;  %v1340_v38 = vunpack.i.h.bf16 %v1338_v20  ;;  %v1339_v39 = vunpack.i.l.bf16 %v1338_v20  ;;  %v55_v20 = vld [vmem:[#allocation2 + $0xa8] sm:$0xff] }
 0x2a2   :  { %1231 = vmatpush3.bf16.xpose.msk.msra.mxu1 %vm1608_vm1, %v1226_v18 }
 0x2a3   :  { %1234 = vmatprep.subr.msk.bf16.mxu1 %vm1608_vm1, %v1232_v22  ;;  %v1238_v32 = vpack.c.bf16 %v1335_v25, %v1334_v26  ;;  %v1244_v45 = vpack.c.bf16 %v1340_v38, %v1339_v39 }
 0x2a4   :  { %v228_v23 = vpop.permute.xlu1 %227  ;;  %v226_v24 = vpop.permute.xlu0 %225 }
 0x2a5   :  { %v250_v27 = vmul.f32 %v1579_v55, %v228_v23  ;;  %v249_v28 = vmul.f32 %v226_v24, %v1582_v57  ;;  %v54_v24 = vld [vmem:[#allocation2 + $0xa0] sm:$0xff] }
 0x2a7   :  { %v1341_v29 = vpack.i.bf16 %v250_v27, %v249_v28 }
 0x2a8   :  { %v232_v30 = vpop.permute.xlu1 %231  ;;  %v230_v31 = vpop.permute.xlu0 %229 }
 0x2a9   :  { %v1621_v33 = vmul.f32 %v1579_v55, %v232_v30  ;;  %v1624_v34 = vmul.f32 %v230_v31, %v1582_v57  ;;  %1342 = vrot.lane.b32.xlu1 %v1341_v29, %s1468_s15 }
 0x2aa   :  { %1237 = vmatpush3.bf16.xpose.msk.msra.mxu1 %vm1608_vm1, %v1232_v22 }
 0x2ab   :  { %v1346_v35 = vpack.i.bf16 %v1621_v33, %v1624_v34  ;;  %1240 = vmatprep.subr.msk.bf16.mxu1 %vm1608_vm1, %v1238_v32 }
 0x2ac   :  { %v236_v36 = vpop.permute.xlu1 %235  ;;  %v234_v37 = vpop.permute.xlu0 %233 }
 0x2ad   :  { %v1634_v40 = vmul.f32 %v1579_v55, %v236_v36  ;;  %v1637_v41 = vmul.f32 %v234_v37, %v1582_v57 }
 0x2af   :  { %v1351_v42 = vpack.i.bf16 %v1634_v40, %v1637_v41 }
 0x2b0   :  { %v240_v43 = vpop.permute.xlu1 %239  ;;  %v238_v44 = vpop.permute.xlu0 %237 }
 0x2b1   :  { %v256_v46 = vmul.f32 %v1579_v55, %v240_v43  ;;  %v255_v47 = vmul.f32 %v238_v44, %v1582_v57 }
 0x2b2   :  { %1243 = vmatpush3.bf16.xpose.msk.msra.mxu1 %vm1608_vm1, %v1238_v32 }
 0x2b3   :  { %v1356_v48 = vpack.i.bf16 %v256_v46, %v255_v47  ;;  %1246 = vmatprep.subr.msk.bf16.mxu1 %vm1608_vm1, %v1244_v45 }
 0x2ba   :  { %1249 = vmatpush3.bf16.xpose.msk.msra.mxu1 %vm1608_vm1, %v1244_v45 }
 0x2c1   :  { %1122 = vmatmul.mubr.msk.f32.vlgmr.msra.gmra.mrb[0].mxu1 %vm72_vm0, %v1579_v55 }
 0x2c2   :  { %1124 = vmatprep.mubr.msk.f32.mxu1 %vm72_vm0, %v1582_v57 }
 0x2c5   :  { %1125 = vmatmul.mubr.msk.f32.gmra.mrb[2].mxu1 %vm72_vm0, %v1579_v55 }
 0x2c6   :  { %1127 = vmatprep.mubr.msk.f32.mxu1 %vm72_vm0, %v1582_v57 }
 0x2c9   :  { %1128 = vmatmul.mubr.msk.f32.gmra.mrb[4].mxu1 %vm72_vm0, %v1579_v55 }
 0x2ca   :  { %1130 = vmatprep.mubr.msk.f32.mxu1 %vm72_vm0, %v1582_v57 }
 0x2cd   :  { %1131 = vmatmul.mubr.msk.f32.gmra.mrb[6].mxu1 %vm72_vm0, %v1579_v55 }
 0x31b   :  { %v1343_v49 = vpop.permute.xlu1 %1342 }
 0x31c   :  { %v1345_v50 = vunpack.i.h.bf16 %v1343_v49  ;;  %v1344_v51 = vunpack.i.l.bf16 %v1343_v49 }
 0x31e   :  { %v1250_v52 = vpack.c.bf16 %v1345_v50, %v1344_v51 }
 0x320   :  { %1251 = vmatprep.subr.bf16.mxu0 %v1250_v52 }
 0x321   :  { %1253 = vmatpush3.bf16.msra.mxu0 %v1250_v52 }
 0x394   :  { %v1123_v56 = vpop.f32.mrb[0].mxu1 }
 0x395   :  { %v375_v58 = vadd.f32 %v1123_v56, %v49_v53  ;;  %v369_v59 = vpop.f32.mrb[1].mxu1 }
 0x396   :  { %v370_v60 = vadd.f32 %v369_v59, %v48_v54 }
 0x397   :  { %v412_v62 = vsel %vm408_vm2, %v375_v58, -inf }
 0x398   :  { %413 = vmax.xlane.f32.xlu1 %v412_v62  ;;  %v1126_v57 = vpop.f32.mrb[2].mxu1  ;;  %v409_v55 = vsel %vm408_vm2, %v370_v60, -inf }
 0x399   :  { %v385_v63 = vadd.f32 %v1126_v57, %v51_v61  ;;  %v379_v2 = vpop.f32.mrb[3].mxu1  ;;  %410 = vmax.xlane.f32.xlu0 %v409_v55 }
 0x39a   :  { %v380_v6 = vadd.f32 %v379_v2, %v50_v3 }
 0x39b   :  { %v418_v5 = vsel %vm408_vm2, %v385_v63, -inf }
 0x39c   :  { %v1129_v7 = vpop.f32.mrb[4].mxu1  ;;  %v415_v18 = vsel %vm408_vm2, %v380_v6, -inf }
 0x39d   :  { %v395_v8 = vadd.f32 %v1129_v7, %v53_v4  ;;  %v389_v9 = vpop.f32.mrb[5].mxu1  ;;  %419 = vmax.xlane.f32.xlu0 %v418_v5 }
 0x39e   :  { %v390_v12 = vadd.f32 %v389_v9, %v52_v10 }
 0x39f   :  { %v424_v11 = vsel %vm408_vm2, %v395_v8, -inf }
 0x3a0   :  { %425 = vmax.xlane.f32.xlu1 %v424_v11  ;;  %v1132_v13 = vpop.f32.mrb[6].mxu1  ;;  %v421_v23 = vsel %vm408_vm2, %v390_v12, -inf }
 0x3a1   :  { %v399_v21 = vpop.f32.mrb[7].mxu1  ;;  %416 = vmax.xlane.f32.xlu0 %v415_v18  ;;  %v405_v22 = vadd.f32 %v1132_v13, %v55_v20 }
 0x3a2   :  { %v400_v25 = vadd.f32 %v399_v21, %v54_v24 }
 0x3a3   :  { %v430_v26 = vsel %vm408_vm2, %v405_v22, -inf }
 0x3a4   :  { %v427_v27 = vsel %vm408_vm2, %v400_v25, -inf }
 0x3a5   :  { %422 = vmax.xlane.f32.xlu0 %v421_v23  ;;  %v1366_v23 = vpack.i.bf16 %v1550_v19, %v1541_v16 }
 0x3a9   :  { %431 = vmax.xlane.f32.xlu0 %v430_v26 }
 0x3ad   :  { %428 = vmax.xlane.f32.xlu0 %v427_v27 }
 0x3b1   :  { %1352 = vrot.lane.b32.xlu1 %v1351_v42, %s1468_s15 }
 0x3b5   :  { %1357 = vrot.lane.b32.xlu1 %v1356_v48, %s1468_s15 }
 0x3c3   :  { %1347 = vrot.lane.b32.xlu0 %v1346_v35, %s1468_s15 }
 0x425   :  { %v414_v28 = vpop.xlane.xlu1 %413 }
 0x426   :  { %v434_v29 = vsub.f32 %v375_v58, %v414_v28  ;;  %v411_v30 = vpop.xlane.xlu0 %410 }
 0x427   :  { %v433_v31 = vsub.f32 %v370_v60, %v411_v30 }
 0x428   :  { %v443_v32 = vmul.f32 1.442695, %v434_v29 }
 0x429   :  { %v441_v36 = vmul.f32 1.442695, %v433_v31 }
 0x42a   :  { %1375 = vpow2.f32 %v443_v32  ;;  %v420_v37 = vpop.xlane.xlu0 %419 }
 0x42b   :  { %1377 = vpow2.f32 %v441_v36  ;;  %v436_v38 = vsub.f32 %v385_v63, %v420_v37 }
 0x42d   :  { %v447_v39 = vmul.f32 1.442695, %v436_v38  ;;  %v426_v40 = vpop.xlane.xlu1 %425 }
 0x42e   :  { %v438_v41 = vsub.f32 %v395_v8, %v426_v40  ;;  %v417_v42 = vpop.xlane.xlu0 %416 }
 0x42f   :  { %1379 = vpow2.f32 %v447_v39  ;;  %v435_v43 = vsub.f32 %v380_v6, %v417_v42 }
 0x430   :  { %v451_v44 = vmul.f32 1.442695, %v438_v41 }
 0x431   :  { %v445_v45 = vmul.f32 1.442695, %v435_v43  ;;  %v1353_v54 = vpop.permute.xlu1 %1352 }
 0x432   :  { %1381 = vpow2.f32 %v451_v44  ;;  %v423_v33 = vpop.xlane.xlu0 %422  ;;  %v1355_v55 = vunpack.i.h.bf16 %v1353_v54  ;;  %v1354_v3 = vunpack.i.l.bf16 %v1353_v54 }
 0x433   :  { %1383 = vpow2.f32 %v445_v45  ;;  %v437_v34 = vsub.f32 %v390_v12, %v423_v33 }
 0x434   :  { %v1376_v35 = vpop.eup %1375  ;;  %v1258_v10 = vpack.c.bf16 %v1355_v55, %v1354_v3  ;;  %v39_v3 = vld [vmem:[#allocation2 + $0x28] sm:$0xff] }
 0x435   :  { %v1378_v46 = vpop.eup %1377  ;;  %v449_v47 = vmul.f32 1.442695, %v437_v34  ;;  %v621_v48 = vsel %vm408_vm2, %v1376_v35, 0.0  ;;  %v1358_v6 = vpop.permute.xlu1 %1357 }
 0x436   :  { %622 = vadd.xlane.f32.xlu0 %v621_v48  ;;  %1149 = vmatprep.mubr.msk.f32.mxu0 %vm408_vm2, %v1378_v46  ;;  %v432_v49 = vpop.xlane.xlu0 %431  ;;  %v618_v50 = vsel %vm408_vm2, %v1378_v46, 0.0  ;;  %v1360_v11 = vunpack.i.h.bf16 %v1358_v6  ;;  %v1359_v12 = vunpack.i.l.bf16 %v1358_v6 }
 0x437   :  { %1385 = vpow2.f32 %v449_v47  ;;  %v440_v51 = vsub.f32 %v405_v22, %v432_v49  ;;  %619 = vadd.xlane.f32.xlu1 %v618_v50 }
 0x438   :  { %v1262_v20 = vpack.c.bf16 %v1360_v11, %v1359_v12 }
 0x439   :  { %v1380_v52 = vpop.eup %1379  ;;  %v455_v53 = vmul.f32 1.442695, %v440_v51 }
 0x43a   :  { %v429_v56 = vpop.xlane.xlu0 %428  ;;  %v627_v58 = vsel %vm408_vm2, %v1380_v52, 0.0 }
 0x43b   :  { %1387 = vpow2.f32 %v455_v53  ;;  %v439_v59 = vsub.f32 %v400_v25, %v429_v56  ;;  %628 = vadd.xlane.f32.xlu1 %v627_v58 }
 0x43c   :  { %v1382_v60 = vpop.eup %1381 }
 0x43d   :  { %v1384_v61 = vpop.eup %1383  ;;  %v453_v62 = vmul.f32 1.442695, %v439_v59  ;;  %v633_v57 = vsel %vm408_vm2, %v1382_v60, 0.0 }
 0x43e   :  { %v1348_v63 = vpop.permute.xlu0 %1347  ;;  %v624_v2 = vsel %vm408_vm2, %v1384_v61, 0.0 }
 0x43f   :  { %1389 = vpow2.f32 %v453_v62  ;;  %v1350_v4 = vunpack.i.h.bf16 %v1348_v63  ;;  %v1349_v5 = vunpack.i.l.bf16 %v1348_v63  ;;  %634 = vadd.xlane.f32.xlu1 %v633_v57  ;;  %625 = vadd.xlane.f32.xlu0 %v624_v2 }
 0x441   :  { %v1386_v7 = vpop.eup %1385  ;;  %v1254_v8 = vpack.c.bf16 %v1350_v4, %v1349_v5  ;;  %v38_v4 = vld [vmem:[#allocation2 + $0x20] sm:$0xff] }
 0x442   :  { %v630_v9 = vsel %vm408_vm2, %v1386_v7, 0.0 }
 0x443   :  { %631 = vadd.xlane.f32.xlu0 %v630_v9  ;;  %1255 = vmatprep.subr.bf16.mxu0 %v1254_v8 }
 0x444   :  { %1257 = vmatpush3.bf16.msra.mxu0 %v1254_v8 }
 0x445   :  { %v1388_v13 = vpop.eup %1387  ;;  %1259 = vmatprep.subr.bf16.mxu0 %v1258_v10 }
 0x446   :  { %v639_v18 = vsel %vm408_vm2, %v1388_v13, 0.0 }
 0x447   :  { %640 = vadd.xlane.f32.xlu1 %v639_v18 }
 0x448   :  { %1261 = vmatpush3.bf16.msra.mxu0 %v1258_v10 }
 0x449   :  { %v1390_v21 = vpop.eup %1389  ;;  %1263 = vmatprep.subr.bf16.mxu0 %v1262_v20 }
 0x44a   :  { %v636_v22 = vsel %vm408_vm2, %v1390_v21, 0.0 }
 0x44b   :  { %637 = vadd.xlane.f32.xlu0 %v636_v22 }
 0x44c   :  { %1265 = vmatpush3.bf16.msra.mxu0 %v1262_v20 }
 0x44f   :  { %1150 = vmatmul.mubr.msk.f32.vlgmr.msra.gmra.mrb[2].mxu0 %vm408_vm2, %v1376_v35 }
 0x450   :  { %1152 = vmatprep.mubr.msk.f32.mxu0 %vm408_vm2, %v1384_v61 }
 0x453   :  { %1153 = vmatmul.mubr.msk.f32.gmra.mrb[4].mxu0 %vm408_vm2, %v1380_v52 }
 0x454   :  { %1155 = vmatprep.mubr.msk.f32.mxu0 %vm408_vm2, %v1386_v7 }
 0x457   :  { %1156 = vmatmul.mubr.msk.f32.gmra.mrb[6].mxu0 %vm408_vm2, %v1382_v60 }
 0x458   :  { %1158 = vmatprep.mubr.msk.f32.mxu0 %vm408_vm2, %v1390_v21  ;;  %1367 = vrot.lane.b32.xlu1 %v1366_v23, %s1466_s13 }
 0x45b   :  { %1159 = vmatmul.mubr.msk.f32.gmra.mrb[8].mxu0 %vm408_vm2, %v1388_v13 }
 0x461   :  { %1362 = vrot.lane.b32.xlu0 %v1361_v17, %s1466_s13 }
 0x4c3   :  { %v623_v25 = vpop.xlane.xlu0 %622 }
 0x4c4   :  { %v620_v24 = vpop.xlane.xlu1 %619  ;;  %1391 = vrcp.f32 %v623_v25 }
 0x4c5   :  { %1393 = vrcp.f32 %v620_v24 }
 0x4c8   :  { %v629_v26 = vpop.xlane.xlu1 %628 }
 0x4c9   :  { %1395 = vrcp.f32 %v629_v26  ;;  %v68_v26 = vld [vmem:[%s1801_s1 + $0x8] sm:$0xff] }
 0x4cc   :  { %v626_v27 = vpop.xlane.xlu0 %625  ;;  %v635_v28 = vpop.xlane.xlu1 %634 }
 0x4cd   :  { %1397 = vrcp.f32 %v626_v27  ;;  %v69_v27 = vld [vmem:[%s1801_s1 + $0x18] sm:$0xff] }
 0x4ce   :  { %1399 = vrcp.f32 %v635_v28  ;;  %v1392_v14 = vpop.eup %1391  ;;  %v1274_v28 = vpack.c.bf16 %v69_v27, %v68_v26 }
 0x4cf   :  { %v1394_v17 = vpop.eup %1393 }
 0x4d0   :  { %v632_v29 = vpop.xlane.xlu0 %631 }
 0x4d1   :  { %1401 = vrcp.f32 %v632_v29  ;;  %v70_v29 = vld [vmem:[%s1801_s1 + $0x28] sm:$0xff] }
 0x4d3   :  { %v1396_v44 = vpop.eup %1395 }
 0x4d4   :  { %v641_v16 = vpop.xlane.xlu1 %640 }
 0x4d5   :  { %1403 = vrcp.f32 %v641_v16  ;;  %v71_v16 = vld [vmem:[%s1801_s1 + $0x38] sm:$0xff] }
 0x4d7   :  { %v1398_v33 = vpop.eup %1397 }
 0x4d8   :  { %v638_v19 = vpop.xlane.xlu0 %637  ;;  %v1368_v30 = vpop.permute.xlu1 %1367 }
 0x4d9   :  { %v1370_v31 = vunpack.i.h.bf16 %v1368_v30  ;;  %v1369_v32 = vunpack.i.l.bf16 %v1368_v30  ;;  %1405 = vrcp.f32 %v638_v19  ;;  %v1400_v48 = vpop.eup %1399  ;;  %v1278_v19 = vpack.c.bf16 %v71_v16, %v70_v29  ;;  %v884_v30 = vld [vmem:[%s1802_s2] sm:$0xff]  ;;  %v44_v29 = vld [vmem:[#allocation2 + $0x50] sm:$0xff] }
 0x4db   :  { %v1270_v40 = vpack.c.bf16 %v1370_v31, %v1369_v32  ;;  %v1402_v51 = vpop.eup %1401  ;;  %v885_v31 = vld [vmem:[%s1802_s2 + $0x8] sm:$0xff]  ;;  %v886_v32 = vld [vmem:[%s1802_s2 + $0x10] sm:$0xff] }
 0x4dc   :  { %v1363_v36 = vpop.permute.xlu0 %1362 }
 0x4dd   :  { %v1365_v37 = vunpack.i.h.bf16 %v1363_v36  ;;  %v1364_v38 = vunpack.i.l.bf16 %v1363_v36  ;;  %v1282_v36 = vpack.c.bf16 %v885_v31, %v884_v30 }
 0x4df   :  { %v1266_v39 = vpack.c.bf16 %v1365_v37, %v1364_v38  ;;  %v1404_v58 = vpop.eup %1403  ;;  %v887_v37 = vld [vmem:[%s1802_s2 + $0x18] sm:$0xff]  ;;  %1283 = vmatprep.subr.bf16.mxu1 %v1282_v36 }
 0x4e0   :  { %v1286_v38 = vpack.c.bf16 %v887_v37, %v886_v32  ;;  %1285 = vmatpush3.bf16.msra.mxu1 %v1282_v36 }
 0x4e1   :  { %1267 = vmatprep.subr.bf16.mxu0 %v1266_v39 }
 0x4e2   :  { %1269 = vmatpush3.bf16.msra.mxu0 %v1266_v39  ;;  %v888_v39 = vld [vmem:[%s1802_s2 + $0x20] sm:$0xff]  ;;  %1287 = vmatprep.subr.bf16.mxu1 %v1286_v38 }
 0x4e3   :  { %1271 = vmatprep.subr.bf16.mxu0 %v1270_v40  ;;  %v1406_v61 = vpop.eup %1405 }
 0x4e4   :  { %1289 = vmatpush3.bf16.msra.mxu1 %v1286_v38 }
 0x4e6   :  { %1273 = vmatpush3.bf16.msra.mxu0 %v1270_v40  ;;  %v889_v40 = vld [vmem:[%s1802_s2 + $0x28] sm:$0xff] }
 0x4e7   :  { %1275 = vmatprep.subr.bf16.mxu0 %v1274_v28 }
 0x522   :  { %v1151_v15 = vpop.f32.mrb[2].mxu0 }
 0x523   :  { %v651_v41 = vmul.f32 %v1392_v14, %v1151_v15  ;;  %v579_v42 = vpop.f32.mrb[3].mxu0  ;;  %v1290_v14 = vpack.c.bf16 %v889_v40, %v888_v39 }
 0x524   :  { %v650_v43 = vmul.f32 %v1394_v17, %v579_v42 }
 0x525   :  { %1291 = vmatprep.subr.bf16.mxu1 %v1290_v14 }
 0x526   :  { %v1154_v45 = vpop.f32.mrb[4].mxu0  ;;  %1293 = vmatpush3.bf16.msra.mxu1 %v1290_v14 }
 0x527   :  { %v653_v34 = vmul.f32 %v1396_v44, %v1154_v45  ;;  %v589_v35 = vpop.f32.mrb[5].mxu0 }
 0x528   :  { %v652_v46 = vmul.f32 %v1398_v33, %v589_v35  ;;  %v41_v33 = vld [vmem:[#allocation2 + $0x38] sm:$0xff] }
 0x529   :  { %v659_v47 = vadd.f32 %v653_v34, %v651_v41 }
 0x52a   :  { %v658_v49 = vadd.f32 %v652_v46, %v650_v43  ;;  %v1157_v50 = vpop.f32.mrb[6].mxu0  ;;  %v40_v46 = vld [vmem:[#allocation2 + $0x30] sm:$0xff] }
 0x52b   :  { %v655_v52 = vmul.f32 %v1400_v48, %v1157_v50  ;;  %v599_v53 = vpop.f32.mrb[7].mxu0 }
 0x52c   :  { %v654_v54 = vmul.f32 %v1402_v51, %v599_v53  ;;  %v43_v51 = vld [vmem:[#allocation2 + $0x48] sm:$0xff] }
 0x52d   :  { %v661_v56 = vadd.f32 %v659_v47, %v655_v52 }
 0x52e   :  { %v660_v59 = vadd.f32 %v658_v49, %v654_v54  ;;  %v1160_v60 = vpop.f32.mrb[8].mxu0  ;;  %v42_v49 = vld [vmem:[#allocation2 + $0x40] sm:$0xff]  ;;  %v890_v54 = vld [vmem:[%s1802_s2 + $0x30] sm:$0xff] }
 0x52f   :  { %v657_v62 = vmul.f32 %v1404_v58, %v1160_v60  ;;  %v609_v57 = vpop.f32.mrb[9].mxu0  ;;  %v893_v60 = vld [vmem:[%s1802_s2 + $0x48] sm:$0xff] }
 0x530   :  { %v656_v55 = vmul.f32 %v1406_v61, %v609_v57  ;;  %v895_v57 = vld [vmem:[%s1802_s2 + $0x58] sm:$0xff] }
 0x531   :  { %v663_v63 = vadd.f32 %v661_v56, %v657_v62  ;;  %v891_v56 = vld [vmem:[%s1802_s2 + $0x38] sm:$0xff]  ;;  %v894_v62 = vld [vmem:[%s1802_s2 + $0x50] sm:$0xff] }
 0x532   :  { %v662_v2 = vadd.f32 %v660_v59, %v656_v55  ;;  %v1294_v58 = vpack.c.bf16 %v891_v56, %v890_v54  ;;  %v892_v59 = vld [vmem:[%s1802_s2 + $0x40] sm:$0xff]  ;;  %v1302_v55 = vpack.c.bf16 %v895_v57, %v894_v62 }
 0x533   :  { %v1298_v61 = vpack.c.bf16 %v893_v60, %v892_v59 }
 0x534   :  { %1169 = vmatprep.mubr.msk.f32.mxu0 %vm72_vm0, %v662_v2  ;;  %1295 = vmatprep.subr.bf16.mxu1 %v1294_v58  ;;  %v897_v2 = vld [vmem:[%s1802_s2 + $0x68] sm:$0xff] }
 0x535   :  { %1170 = vmatmul.mubr.msk.f32.vlgmr.msra.gmra.mrb[10].mxu0 %vm72_vm0, %v663_v63  ;;  %1297 = vmatpush3.bf16.msra.mxu1 %v1294_v58  ;;  %v896_v63 = vld [vmem:[%s1802_s2 + $0x60] sm:$0xff] }
 0x536   :  { %1277 = vmatpush3.bf16.msra.mxu0 %v1274_v28  ;;  %1299 = vmatprep.subr.bf16.mxu1 %v1298_v61  ;;  %v45_v28 = vld [vmem:[#allocation2 + $0x58] sm:$0xff] }
 0x537   :  { %1279 = vmatprep.subr.bf16.mxu0 %v1278_v19 }
 0x539   :  { %1301 = vmatpush3.bf16.msra.mxu1 %v1298_v61 }
 0x53a   :  { %1281 = vmatpush3.bf16.msra.mxu0 %v1278_v19  ;;  %1303 = vmatprep.subr.bf16.mxu1 %v1302_v55 }
 0x53d   :  { %1305 = vmatpush3.bf16.msra.mxu1 %v1302_v55 }
 0x608   :  { %v1171_v5 = vpop.f32.mrb[10].mxu0 }
 0x609   :  { %v758_v6 = vadd.f32 %v1171_v5, %v39_v3  ;;  %v752_v7 = vpop.f32.mrb[11].mxu0  ;;  %v1306_v3 = vpack.c.bf16 %v897_v2, %v896_v63  ;;  %v899_v5 = vld [vmem:[%s1802_s2 + $0x78] sm:$0xff] }
 0x60a   :  { %v753_v8 = vadd.f32 %v752_v7, %v38_v4  ;;  %v898_v4 = vld [vmem:[%s1802_s2 + $0x70] sm:$0xff]  ;;  %v47_v7 = vld [vmem:[#allocation2 + $0x68] sm:$0xff]  ;;  %s1469_s2 = smov [#allocation5]  }
 0x60b   :  { %v1706_v9 = vadd.f32 %v758_v6, %v1518_v1  ;;  %1307 = vmatprep.subr.bf16.mxu1 %v1306_v3  ;;  %v1310_v6 = vpack.c.bf16 %v899_v5, %v898_v4  ;;  %s984_s5 = sshll.u32 %s1469_s2, 4  ;;  %s985_s5 = int_to_ptr.vmem [resolvable:$true] %s984_s5 }
 0x60c   :  { %v1709_v10 = vadd.f32 %v753_v8, %v1513_v0  ;;  %1309 = vmatpush3.bf16.msra.mxu1 %v1306_v3  ;;  %v46_v8 = vld [vmem:[#allocation2 + $0x60] sm:$0xff]  ;;  %s1437_s6 = scalar_lea.vmem %s985_s5, 256  ;;  %p1442_p9 = scmp.lt.s32.totalorder %s985_s5, %s985_s5 }
 0x60d   :  { %v766_v11 = vsel %vm72_vm0, %v1706_v9, 0.0  ;;  %1311 = vmatprep.subr.bf16.mxu1 %v1310_v6  ;;  %p1438_p8 = scmp.ne.s32.totalorder %s985_s5, %s1437_s6  ;;  %p1443_p10 = scmp.lt.s32.totalorder %s1437_s6, %s1437_s6 }
 0x60e   :  { %767 = vadd.xlane.f32.xlu0 %v766_v11  ;;  %v763_v12 = vsel %vm72_vm0, %v1709_v10, 0.0 }
 0x60f   :  { %764 = vadd.xlane.f32.xlu1 %v763_v12  ;;  %p1444_p11 = por %p1443_p10, %p1442_p9 }
 0x610   :  { %1313 = vmatpush3.bf16.msra.mxu1 %v1310_v6 }
 0x611   :  { %p1445_p12 = pnand %p1444_p11, %p1438_p8 }
 0x69b   :  { %v768_v13 = vpop.xlane.xlu0 %767 }
 0x69c   :  { %v770_v18 = vmul.f32 0.03125, %v768_v13  ;;  %v765_v20 = vpop.xlane.xlu1 %764 }
 0x69d   :  { %v769_v21 = vmul.f32 0.03125, %v765_v20 }
 0x69e   :  { %v772_v22 = vsub.f32 %v1706_v9, %v770_v18 }
 0x69f   :  { %v771_v1 = vsub.f32 %v1709_v10, %v769_v21 }
 0x6a0   :  { %v774_v23 = vmul.f32 %v772_v22, %v772_v22 }
 0x6a1   :  { %v773_v24 = vmul.f32 %v771_v1, %v771_v1 }
 0x6a2   :  { %v778_v0 = vsel %vm72_vm0, %v774_v23, 0.0 }
 0x6a3   :  { %779 = vadd.xlane.f32.xlu1 %v778_v0  ;;  %v775_v25 = vsel %vm72_vm0, %v773_v24, 0.0 }
 0x6a4   :  { %776 = vadd.xlane.f32.xlu0 %v775_v25 }
 0x730   :  { %v780_v15 = vpop.xlane.xlu1 %779 }
 0x731   :  { %v782_v17 = vmul.f32 0.03125, %v780_v15  ;;  %v777_v41 = vpop.xlane.xlu0 %776 }
 0x732   :  { %v781_v42 = vmul.f32 0.03125, %v777_v41 }
 0x733   :  { %v784_v43 = vadd.f32 1e-05, %v782_v17 }
 0x734   :  { %v783_v44 = vadd.f32 1e-05, %v781_v42 }
 0x735   :  { %1407 = vrsqrt.f32 %v784_v43 }
 0x736   :  { %1409 = vrsqrt.f32 %v783_v44 }
 0x73f   :  { %v1408_v45 = vpop.eup %1407 }
 0x740   :  { %v1410_v34 = vpop.eup %1409  ;;  %v788_v35 = vmul.f32 %v1408_v45, %v772_v22 }
 0x741   :  { %v787_v47 = vmul.f32 %v1410_v34, %v771_v1 }
 0x742   :  { %v790_v48 = vmul.f32 %v788_v35, %v41_v33 }
 0x743   :  { %v789_v50 = vmul.f32 %v787_v47, %v40_v46 }
 0x744   :  { %v792_v53 = vadd.f32 %v790_v48, %v43_v51 }
 0x745   :  { %v791_v52 = vadd.f32 %v789_v50, %v42_v49 }
 0x747   :  { %1180 = vmatprep.mubr.msk.f32.mxu0 %vm72_vm0, %v791_v52 }
 0x748   :  { %1181 = vmatmul.mubr.msk.f32.vlgmr.msra.gmra.mrb[12].mxu0 %vm72_vm0, %v792_v53 }
 0x81b   :  { %v1182_v11 = vpop.f32.mrb[12].mxu0 }
 0x81c   :  { %v871_v12 = vadd.f32 %v1182_v11, %v47_v7  ;;  %v865_v13 = vpop.f32.mrb[13].mxu0 }
 0x81d   :  { %v866_v18 = vadd.f32 %v865_v13, %v46_v8 }
 0x81e   :  { %v877_v20 = vmul.f32 0.70710677, %v871_v12  ;;  %v875_v25 = vmul.f32 0.5, %v871_v12 }
 0x81f   :  { %v876_v21 = vmul.f32 0.70710677, %v866_v18  ;;  %v874_v24 = vmul.f32 0.5, %v866_v18 }
 0x820   :  { %1411 = verf.f32 %v877_v20 }
 0x821   :  { %1413 = verf.f32 %v876_v21 }
 0x82a   :  { %v1412_v22 = vpop.eup %1411 }
 0x82b   :  { %v1414_v1 = vpop.eup %1413  ;;  %v881_v23 = vadd.f32 1.0, %v1412_v22 }
 0x82c   :  { %v880_v0 = vadd.f32 1.0, %v1414_v1 }
 0x82d   :  { %v883_v27 = vmul.f32 %v881_v23, %v875_v25 }
 0x82e   :  { %v882_v26 = vmul.f32 %v880_v0, %v874_v24 }
 0x830   :  { %1215 = vmatprep.mubr.f32.mxu1 %v882_v26 }
 0x831   :  { %1216 = vmatmul.mubr.f32.vlgmr.msra.gmra.mrb[8].mxu1 %v883_v27 }
 0x904   :  { %v1217_v16 = vpop.f32.mrb[8].mxu1 }
 0x905   :  { %v972_v19 = vadd.f32 %v1217_v16, %v45_v28  ;;  %v966_v30 = vpop.f32.mrb[9].mxu1 }
 0x906   :  { %v967_v31 = vadd.f32 %v966_v30, %v44_v29 }
 0x907   :  { %v976_v32 = vadd.f32 %v972_v19, %v1706_v9 }
 0x908   :  { %v975_v36 = vadd.f32 %v967_v31, %v1709_v10 }
 0x909   :  { %978 = vst.msk [vmem:[#allocation5 + $0x8] sm:$0xff] %vm72_vm0, %v976_v32 }
 0x90a   :  { %977 = vst.msk [vmem:[#allocation5] sm:$0xff] %vm72_vm0, %v975_v36 }
 0x90b   :  { %1448 = shalt.err (!%p1445_p12)
}
 0x90c   :  { %s1449_s3 = scalar_lea.hbm %s1804_s4, 256 }
 0x90d   :  { %p1450_p13 = scmp.ne.s32.totalorder %s1804_s4, %s1449_s3  ;;  %p1453_p0 = scmp.lt.u32.totalorder %s1449_s3, %s1804_s4 }
 0x90f   :  { %p1455_p1 = pnand %p1453_p0, %p1450_p13 }
 0x911   :  { %1458 = shalt.err (!%p1455_p1)
}
 0x912   :  { %990 = dma.vmem_to_hbm [thread:$0]  %s985_s5, 256, %s1804_s4, [#allocation4], %s1464_s25, %s1464_s25, %s1465_s26  }
 0x913   :  { %1461 = dma.done.wait [#allocation4], 256  }
 0x914   :  { %1462 = vsyncadd [#allocation4], 4294967040 }
 0x915   :  { %994 = vsyncpa [#allocation3], 1 }
 0x916   :  { %995 = vsyncpa [#allocation4], 1 }

</bundles_post_ra>
